<compile_context>
chip_gen: v7x
topology: tpu7x:2x2x1
jax: 0.10.0
libtpu: 0.0.40
codegen_flags: <defaults>
</compile_context>

<pallas_src>
import math

import jax
import jax.numpy as jnp
from jax.experimental import pallas as pl
from jax.experimental.pallas import tpu as pltpu


def _make_attention_kernel(*, n_heads, n_kv_heads, head_dim, seq_len, scale,
                           mask_mode, compute_dtype):
    """mask_mode: 'none' | 'causal' (generated in-kernel) | 'additive' (mask passed as input)."""
    n_rep = n_heads // n_kv_heads
    S = seq_len
    hd = head_dim

    def kernel(*refs):
        if mask_mode == "additive":
            x_ref, wq_ref, wk_ref, wv_ref, wo3_ref, mask_ref, o_ref = refs
        else:
            x_ref, wq_ref, wk_ref, wv_ref, wo3_ref, o_ref = refs
            mask_ref = None

        xb = x_ref[0]                                                    # (S, D)

        # ---- QKV projections: three wide 2-D MXU matmuls with f32 accumulation.
        # Scale folded into Q here (one (S, H*hd) multiply) instead of per (S,S) score tile.
        xq = (jnp.dot(xb, wq_ref[...], preferred_element_type=jnp.float32)
              * scale).astype(compute_dtype)                             # (S, H*hd)
        xk = jnp.dot(xb, wk_ref[...],
                     preferred_element_type=jnp.float32).astype(compute_dtype)  # (S, KV*hd)
        xv = jnp.dot(xb, wv_ref[...],
                     preferred_element_type=jnp.float32).astype(compute_dtype)  # (S, KV*hd)

        # ---- Heads -> leading batch axis (static lane slices + major-dim stack), so the
        # attention matmuls are head-batched dot_generals (no per-head loop / k.T / concat).
        # GQA repeat_kv is free: query head h reads the lanes of kv head h // n_rep.
        q3 = jnp.stack([xq[:, h * hd:(h + 1) * hd] for h in range(n_heads)], axis=0)
        k3 = jnp.stack([xk[:, (h // n_rep) * hd:(h // n_rep + 1) * hd]
                        for h in range(n_heads)], axis=0)                # (H, S, hd)
        v3 = jnp.stack([xv[:, (h // n_rep) * hd:(h // n_rep + 1) * hd]
                        for h in range(n_heads)], axis=0)                # (H, S, hd)

        # ---- Scores: batched over heads, contracting head_dim of both operands (no transpose).
        scores = jnp.einsum("hqd,hkd->hqk", q3, k3,
                            preferred_element_type=jnp.float32)          # (H, S, S) f32

        if mask_mode == "additive":
            scores = scores + mask_ref[...][None, :, :]
        elif mask_mode == "causal":
            # Causal mask generated in-kernel: two iotas + a select, no O(S^2) HBM traffic.
            rows = jax.lax.broadcasted_iota(jnp.int32, (S, S), 0)
            cols = jax.lax.broadcasted_iota(jnp.int32, (S, S), 1)
            scores = jnp.where((cols <= rows)[None, :, :], scores, jnp.float32(-1e30))

        # ---- Softmax in f32 (matches F.softmax(scores.float(), dim=-1)); normalization is
        # deferred to the (H, S, hd) context via an approximate reciprocal (EUP slot).
        m = jnp.max(scores, axis=-1, keepdims=True)                      # (H, S, 1)
        p = jnp.exp(scores - m)                                          # (H, S, S) unnormalized
        l = jnp.sum(p, axis=-1, keepdims=True)                           # (H, S, 1)

        ctx = jnp.einsum("hqk,hkd->hqd", p.astype(compute_dtype), v3,
                         preferred_element_type=jnp.float32)             # (H, S, hd) f32
        ctx = ctx * pl.reciprocal(l, approx=True)                        # deferred normalization

        # ---- Output projection: head-batched matmul against per-head wo blocks, then reduce
        # over heads. Mathematically identical to concat(heads, lanes) @ wo, with no lane
        # concatenate / (H,S,hd)->(S,H*hd) relayout.
        outh = jnp.einsum("hqd,hde->hqe", ctx.astype(compute_dtype), wo3_ref[...],
                          preferred_element_type=jnp.float32)            # (H, S, D)
        o_ref[0] = jnp.sum(outh, axis=0).astype(o_ref.dtype)             # (S, D)

    return kernel


def attention_forward(x, wq, wk, wv, wo, mask=None, *, n_heads, n_kv_heads,
                      causal=False, compute_dtype=jnp.float32):
    """Fused GQA attention forward (projections + softmax + attention + output projection)
    in one Pallas kernel, gridded over the batch dimension.

    mask:  optional (S, S) additive mask (module semantics).  If mask is None and causal=True,
           a causal mask is generated in-kernel (no mask DMA).  If mask is None and causal=False,
           no masking is applied (module behaviour for mask=None).
    compute_dtype: dtype of MXU matmul operands (f32 or bf16); accumulation & softmax stay f32.
    """
    B, S, D = x.shape
    head_dim = D // n_heads
    kv_dim = n_kv_heads * head_dim
    scale = 1.0 / math.sqrt(head_dim)

    mask_mode = "additive" if mask is not None else ("causal" if causal else "none")
    cdt = jnp.dtype(compute_dtype)

    # Cast matmul operands at the call boundary (halves HBM traffic for bf16); output stays x.dtype.
    xc = x.astype(cdt)
    wqc = wq.astype(cdt)
    wkc = wk.astype(cdt)
    wvc = wv.astype(cdt)
    wo3 = wo.reshape(n_heads, head_dim, D).astype(cdt)   # per-head output-projection blocks

    kernel = _make_attention_kernel(
        n_heads=n_heads, n_kv_heads=n_kv_heads, head_dim=head_dim, seq_len=S,
        scale=scale, mask_mode=mask_mode, compute_dtype=cdt)

    in_specs = [
        pl.BlockSpec((1, S, D), lambda b: (b, 0, 0)),               # x: one batch row per step
        pl.BlockSpec((D, n_heads * head_dim), lambda b: (0, 0)),    # wq (in, out)
        pl.BlockSpec((D, kv_dim), lambda b: (0, 0)),                # wk
        pl.BlockSpec((D, kv_dim), lambda b: (0, 0)),                # wv
        pl.BlockSpec((n_heads, head_dim, D), lambda b: (0, 0, 0)),  # wo as (H, hd, D)
    ]
    args = [xc, wqc, wkc, wvc, wo3]
    if mask_mode == "additive":
        in_specs.append(pl.BlockSpec((S, S), lambda b: (0, 0)))     # additive mask (kept f32)
        args.append(mask.astype(jnp.float32))

    return pl.pallas_call(
        kernel,
        out_shape=jax.ShapeDtypeStruct((B, S, D), x.dtype),
        grid=(B,),
        in_specs=in_specs,
        out_specs=pl.BlockSpec((1, S, D), lambda b: (b, 0, 0)),
        compiler_params=pltpu.CompilerParams(dimension_semantics=("parallel",)),
    )(*args)


def reference_forward(x, wq, wk, wv, wo, mask, *, n_heads, n_kv_heads):
    """Pure-JAX reference mirroring the PyTorch forward (for correctness check)."""
    B, S, D = x.shape
    hd = D // n_heads
    n_rep = n_heads // n_kv_heads
    xq = (x @ wq).reshape(B, S, n_heads, hd)
    xk = (x @ wk).reshape(B, S, n_kv_heads, hd)
    xv = (x @ wv).reshape(B, S, n_kv_heads, hd)
    xk = jnp.repeat(xk, n_rep, axis=2)      # repeat_kv
    xv = jnp.repeat(xv, n_rep, axis=2)
    q = xq.transpose(0, 2, 1, 3)            # (B, H, S, hd)
    k = xk.transpose(0, 2, 1, 3)
    v = xv.transpose(0, 2, 1, 3)
    scores = jnp.einsum("bhqd,bhkd->bhqk", q, k) / math.sqrt(hd) + mask[None, None]
    p = jax.nn.softmax(scores.astype(jnp.float32), axis=-1)
    out = jnp.einsum("bhqk,bhkd->bhqd", p, v)
    out = out.transpose(0, 2, 1, 3).reshape(B, S, -1)
    return out @ wo


if __name__ == "__main__":
    # Small shapes consistent with the module: dim=32, n_heads=4, n_kv_heads=2 -> head_dim=8, n_rep=2
    B, S, D = 2, 8, 32
    N_HEADS, N_KV_HEADS = 4, 2
    HEAD_DIM = D // N_HEADS

    key = jax.random.PRNGKey(0)
    kx, kq, kk, kv, ko = jax.random.split(key, 5)

    x = jax.random.normal(kx, (B, S, D), dtype=jnp.float32)
    # nn.Linear(dim, out, bias=False) weights, stored pre-transposed as (in, out)
    wq = jax.random.normal(kq, (D, N_HEADS * HEAD_DIM), dtype=jnp.float32) * (1.0 / math.sqrt(D))
    wk = jax.random.normal(kk, (D, N_KV_HEADS * HEAD_DIM), dtype=jnp.float32) * (1.0 / math.sqrt(D))
    wv = jax.random.normal(kv, (D, N_KV_HEADS * HEAD_DIM), dtype=jnp.float32) * (1.0 / math.sqrt(D))
    wo = jax.random.normal(ko, (N_HEADS * HEAD_DIM, D), dtype=jnp.float32) * (1.0 / math.sqrt(D))

    # causal additive mask, same semantics as the `mask` argument in the PyTorch forward
    mask = jnp.where(jnp.tril(jnp.ones((S, S), dtype=bool)), 0.0, -1e9).astype(jnp.float32)

    ref = reference_forward(x, wq, wk, wv, wo, mask, n_heads=N_HEADS, n_kv_heads=N_KV_HEADS)

    # 1) f32 operands, causal mask generated in-kernel (no O(S^2) mask DMA)
    out_causal = attention_forward(x, wq, wk, wv, wo, mask=None, causal=True,
                                   n_heads=N_HEADS, n_kv_heads=N_KV_HEADS)
    out_causal = jax.block_until_ready(out_causal)
    assert out_causal.shape == (B, S, D)
    assert jnp.allclose(out_causal, ref, atol=5e-3, rtol=5e-3), "mismatch (causal in-kernel mask)"

    # 2) f32 operands, explicit additive mask (general-mask path of the module)
    out_masked = attention_forward(x, wq, wk, wv, wo, mask=mask,
                                   n_heads=N_HEADS, n_kv_heads=N_KV_HEADS)
    out_masked = jax.block_until_ready(out_masked)
    assert jnp.allclose(out_masked, ref, atol=5e-3, rtol=5e-3), "mismatch (explicit additive mask)"

    # 3) bf16 matmul operands (f32 accumulation + f32 softmax), looser tolerance
    out_bf16 = attention_forward(x, wq, wk, wv, wo, mask=None, causal=True,
                                 n_heads=N_HEADS, n_kv_heads=N_KV_HEADS,
                                 compute_dtype=jnp.bfloat16)
    out_bf16 = jax.block_until_ready(out_bf16)
    assert jnp.allclose(out_bf16.astype(jnp.float32), ref, atol=1e-1, rtol=1e-1), "mismatch (bf16)"

    print("KERNEL_OK")
</pallas_src>

<mosaic_0001>
module attributes {stable_mosaic.version = 11 : i64} {
  func.func @kernel(%arg0: i32, %arg1: memref<1x8x32xf32, #tpu.memory_space<vmem>>, %arg2: memref<32x32xf32, #tpu.memory_space<vmem>>, %arg3: memref<32x16xf32, #tpu.memory_space<vmem>>, %arg4: memref<32x16xf32, #tpu.memory_space<vmem>>, %arg5: memref<4x8x32xf32, #tpu.memory_space<vmem>>, %arg6: memref<1x8x32xf32, #tpu.memory_space<vmem>>) attributes {dimension_semantics = [#tpu.dimension_semantics<parallel>], iteration_bounds = array<i64: 2>, scalar_prefetch = 0 : i64, scratch_operands = 0 : i64, tpu.core_type = #tpu.core_type<tc>, window_params = [{transform_indices = @transform_0, window_bounds = array<i64: 1, 8, 32>}, {pipeline_mode = #tpu.pipeline_mode<synchronous>, transform_indices = @transform_1, window_bounds = array<i64: 32, 32>}, {pipeline_mode = #tpu.pipeline_mode<synchronous>, transform_indices = @transform_2, window_bounds = array<i64: 32, 16>}, {pipeline_mode = #tpu.pipeline_mode<synchronous>, transform_indices = @transform_3, window_bounds = array<i64: 32, 16>}, {pipeline_mode = #tpu.pipeline_mode<synchronous>, transform_indices = @transform_4, window_bounds = array<i64: 4, 8, 32>}, {transform_indices = @transform_5, window_bounds = array<i64: 1, 8, 32>}]} {
    %c0 = arith.constant 0 : index
    %c0_0 = arith.constant 0 : index
    %c0_1 = arith.constant 0 : index
    %0 = vector.load %arg1[%c0, %c0_0, %c0_1] : memref<1x8x32xf32, #tpu.memory_space<vmem>>, vector<1x8x32xf32>
    %1 = vector.shape_cast %0 : vector<1x8x32xf32> to vector<8x32xf32>
    %c0_2 = arith.constant 0 : index
    %c0_3 = arith.constant 0 : index
    %2 = vector.load %arg2[%c0_2, %c0_3] : memref<32x32xf32, #tpu.memory_space<vmem>>, vector<32x32xf32>
    %cst = arith.constant dense<0.000000e+00> : vector<8x32xf32>
    %3 = tpu.matmul %1, %2, %cst {dimension_numbers = #tpu.dot_dimension_numbers<[1], [0], [0], [1], [0, 0, 1, 1], [], []>} : vector<8x32xf32>, vector<32x32xf32>, vector<8x32xf32> -> vector<8x32xf32>
    %cst_4 = arith.constant 0.353553385 : f32
    %4 = vector.broadcast %cst_4 : f32 to vector<8x32xf32>
    %5 = arith.mulf %3, %4 : vector<8x32xf32>
    %c0_5 = arith.constant 0 : index
    %c0_6 = arith.constant 0 : index
    %6 = vector.load %arg3[%c0_5, %c0_6] : memref<32x16xf32, #tpu.memory_space<vmem>>, vector<32x16xf32>
    %cst_7 = arith.constant dense<0.000000e+00> : vector<8x16xf32>
    %7 = tpu.matmul %1, %6, %cst_7 {dimension_numbers = #tpu.dot_dimension_numbers<[1], [0], [0], [1], [0, 0, 1, 1], [], []>} : vector<8x32xf32>, vector<32x16xf32>, vector<8x16xf32> -> vector<8x16xf32>
    %c0_8 = arith.constant 0 : index
    %c0_9 = arith.constant 0 : index
    %8 = vector.load %arg4[%c0_8, %c0_9] : memref<32x16xf32, #tpu.memory_space<vmem>>, vector<32x16xf32>
    %cst_10 = arith.constant dense<0.000000e+00> : vector<8x16xf32>
    %9 = tpu.matmul %1, %8, %cst_10 {dimension_numbers = #tpu.dot_dimension_numbers<[1], [0], [0], [1], [0, 0, 1, 1], [], []>} : vector<8x32xf32>, vector<32x16xf32>, vector<8x16xf32> -> vector<8x16xf32>
    %10 = vector.extract_strided_slice %5 {offsets = [0, 0], sizes = [8, 8], strides = [1, 1]} : vector<8x32xf32> to vector<8x8xf32>
    %11 = vector.extract_strided_slice %5 {offsets = [0, 8], sizes = [8, 8], strides = [1, 1]} : vector<8x32xf32> to vector<8x8xf32>
    %12 = vector.extract_strided_slice %5 {offsets = [0, 16], sizes = [8, 8], strides = [1, 1]} : vector<8x32xf32> to vector<8x8xf32>
    %13 = vector.extract_strided_slice %5 {offsets = [0, 24], sizes = [8, 8], strides = [1, 1]} : vector<8x32xf32> to vector<8x8xf32>
    %14 = vector.shape_cast %10 : vector<8x8xf32> to vector<1x8x8xf32>
    %15 = vector.shape_cast %11 : vector<8x8xf32> to vector<1x8x8xf32>
    %16 = vector.shape_cast %12 : vector<8x8xf32> to vector<1x8x8xf32>
    %17 = vector.shape_cast %13 : vector<8x8xf32> to vector<1x8x8xf32>
    %18 = tpu.concatenate %14, %15, %16, %17 in 0 : vector<1x8x8xf32>, vector<1x8x8xf32>, vector<1x8x8xf32>, vector<1x8x8xf32> -> vector<4x8x8xf32>
    %19 = vector.extract_strided_slice %7 {offsets = [0, 0], sizes = [8, 8], strides = [1, 1]} : vector<8x16xf32> to vector<8x8xf32>
    %20 = vector.extract_strided_slice %7 {offsets = [0, 0], sizes = [8, 8], strides = [1, 1]} : vector<8x16xf32> to vector<8x8xf32>
    %21 = vector.extract_strided_slice %7 {offsets = [0, 8], sizes = [8, 8], strides = [1, 1]} : vector<8x16xf32> to vector<8x8xf32>
    %22 = vector.extract_strided_slice %7 {offsets = [0, 8], sizes = [8, 8], strides = [1, 1]} : vector<8x16xf32> to vector<8x8xf32>
    %23 = vector.shape_cast %19 : vector<8x8xf32> to vector<1x8x8xf32>
    %24 = vector.shape_cast %20 : vector<8x8xf32> to vector<1x8x8xf32>
    %25 = vector.shape_cast %21 : vector<8x8xf32> to vector<1x8x8xf32>
    %26 = vector.shape_cast %22 : vector<8x8xf32> to vector<1x8x8xf32>
    %27 = tpu.concatenate %23, %24, %25, %26 in 0 : vector<1x8x8xf32>, vector<1x8x8xf32>, vector<1x8x8xf32>, vector<1x8x8xf32> -> vector<4x8x8xf32>
    %28 = vector.extract_strided_slice %9 {offsets = [0, 0], sizes = [8, 8], strides = [1, 1]} : vector<8x16xf32> to vector<8x8xf32>
    %29 = vector.extract_strided_slice %9 {offsets = [0, 0], sizes = [8, 8], strides = [1, 1]} : vector<8x16xf32> to vector<8x8xf32>
    %30 = vector.extract_strided_slice %9 {offsets = [0, 8], sizes = [8, 8], strides = [1, 1]} : vector<8x16xf32> to vector<8x8xf32>
    %31 = vector.extract_strided_slice %9 {offsets = [0, 8], sizes = [8, 8], strides = [1, 1]} : vector<8x16xf32> to vector<8x8xf32>
    %32 = vector.shape_cast %28 : vector<8x8xf32> to vector<1x8x8xf32>
    %33 = vector.shape_cast %29 : vector<8x8xf32> to vector<1x8x8xf32>
    %34 = vector.shape_cast %30 : vector<8x8xf32> to vector<1x8x8xf32>
    %35 = vector.shape_cast %31 : vector<8x8xf32> to vector<1x8x8xf32>
    %36 = tpu.concatenate %32, %33, %34, %35 in 0 : vector<1x8x8xf32>, vector<1x8x8xf32>, vector<1x8x8xf32>, vector<1x8x8xf32> -> vector<4x8x8xf32>
    "tpu.trace_start"() <{level = 10 : i32, message = "hqd,hkd->hqk"}> : () -> ()
    %cst_11 = arith.constant dense<0.000000e+00> : vector<4x8x8xf32>
    %37 = tpu.matmul %18, %27, %cst_11 {dimension_numbers = #tpu.dot_dimension_numbers<[2], [2], [1], [1], [0, 0, 0, 1, 1, 1], [0], [0]>} : vector<4x8x8xf32>, vector<4x8x8xf32>, vector<4x8x8xf32> -> vector<4x8x8xf32>
    "tpu.trace_stop"() : () -> ()
    %38 = tpu.iota {dimensions = array<i32: 0>} : vector<8x8xi32>
    %39 = tpu.iota {dimensions = array<i32: 1>} : vector<8x8xi32>
    %40 = arith.cmpi sle, %39, %38 : vector<8x8xi32>
    %41 = vector.shape_cast %40 : vector<8x8xi1> to vector<1x8x8xi1>
    %cst_12 = arith.constant -1.000000e+30 : f32
    %42 = vector.shape_cast %41 : vector<1x8x8xi1> to vector<1x8x8xi1>
    %43 = vector.broadcast %42 : vector<1x8x8xi1> to vector<4x8x8xi1>
    %44 = vector.broadcast %cst_12 : f32 to vector<4x8x8xf32>
    %45 = arith.select %43, %37, %44 : vector<4x8x8xi1>, vector<4x8x8xf32>
    %cst_13 = arith.constant dense<0xFF800000> : vector<4x8xf32>
    %46 = vector.multi_reduction <maximumf>, %45, %cst_13 [2] : vector<4x8x8xf32> to vector<4x8xf32>
    %47 = vector.shape_cast %46 : vector<4x8xf32> to vector<4x8x1xf32>
    %48 = vector.broadcast %47 : vector<4x8x1xf32> to vector<4x8x8xf32>
    %49 = arith.subf %45, %48 : vector<4x8x8xf32>
    %50 = math.exp %49 : vector<4x8x8xf32>
    %cst_14 = arith.constant dense<0.000000e+00> : vector<4x8xf32>
    %51 = vector.multi_reduction <add>, %50, %cst_14 [2] : vector<4x8x8xf32> to vector<4x8xf32>
    %52 = vector.shape_cast %51 : vector<4x8xf32> to vector<4x8x1xf32>
    "tpu.trace_start"() <{level = 10 : i32, message = "hqk,hkd->hqd"}> : () -> ()
    %cst_15 = arith.constant dense<0.000000e+00> : vector<4x8x8xf32>
    %53 = tpu.matmul %50, %36, %cst_15 {dimension_numbers = #tpu.dot_dimension_numbers<[2], [1], [1], [2], [0, 0, 0, 1, 1, 2], [0], [0]>} : vector<4x8x8xf32>, vector<4x8x8xf32>, vector<4x8x8xf32> -> vector<4x8x8xf32>
    "tpu.trace_stop"() : () -> ()
    %54 = tpu.reciprocal %52 {approx = true} : vector<4x8x1xf32> -> vector<4x8x1xf32>
    %55 = vector.broadcast %54 : vector<4x8x1xf32> to vector<4x8x8xf32>
    %56 = arith.mulf %53, %55 : vector<4x8x8xf32>
    %c0_16 = arith.constant 0 : index
    %c0_17 = arith.constant 0 : index
    %c0_18 = arith.constant 0 : index
    %57 = vector.load %arg5[%c0_16, %c0_17, %c0_18] : memref<4x8x32xf32, #tpu.memory_space<vmem>>, vector<4x8x32xf32>
    "tpu.trace_start"() <{level = 10 : i32, message = "hqd,hde->hqe"}> : () -> ()
    %cst_19 = arith.constant dense<0.000000e+00> : vector<4x8x32xf32>
    %58 = tpu.matmul %56, %57, %cst_19 {dimension_numbers = #tpu.dot_dimension_numbers<[2], [1], [1], [2], [0, 0, 0, 1, 1, 2], [0], [0]>} : vector<4x8x8xf32>, vector<4x8x32xf32>, vector<4x8x32xf32> -> vector<4x8x32xf32>
    "tpu.trace_stop"() : () -> ()
    %cst_20 = arith.constant dense<0.000000e+00> : vector<8x32xf32>
    %59 = vector.multi_reduction <add>, %58, %cst_20 [0] : vector<4x8x32xf32> to vector<8x32xf32>
    %c0_21 = arith.constant 0 : index
    %c0_22 = arith.constant 0 : index
    %c0_23 = arith.constant 0 : index
    %60 = vector.load %arg6[%c0_21, %c0_22, %c0_23] : memref<1x8x32xf32, #tpu.memory_space<vmem>>, vector<1x8x32xf32>
    %61 = vector.shape_cast %60 : vector<1x8x32xf32> to vector<8x32xf32>
    %62 = vector.shape_cast %59 : vector<8x32xf32> to vector<1x8x32xf32>
    tpu.vector_store %arg6[%c0_21, %c0_22, %c0_23], %62 {strides = array<i32>} : memref<1x8x32xf32, #tpu.memory_space<vmem>>, vector<1x8x32xf32>,
    return
  }
  func.func @transform_0(%arg0: i32) -> (i32, i32, i32) {
    %c0_i32 = arith.constant 0 : i32
    %c0_i32_0 = arith.constant 0 : i32
    %c0_i32_1 = arith.constant 0 : i32
    return %arg0, %c0_i32, %c0_i32_0 : i32, i32, i32
  }
  func.func @transform_1(%arg0: i32) -> (i32, i32) {
    %c0_i32 = arith.constant 0 : i32
    %c0_i32_0 = arith.constant 0 : i32
    %c0_i32_1 = arith.constant 0 : i32
    return %c0_i32, %c0_i32_0 : i32, i32
  }
  func.func @transform_2(%arg0: i32) -> (i32, i32) {
    %c0_i32 = arith.constant 0 : i32
    %c0_i32_0 = arith.constant 0 : i32
    %c0_i32_1 = arith.constant 0 : i32
    return %c0_i32, %c0_i32_0 : i32, i32
  }
  func.func @transform_3(%arg0: i32) -> (i32, i32) {
    %c0_i32 = arith.constant 0 : i32
    %c0_i32_0 = arith.constant 0 : i32
    %c0_i32_1 = arith.constant 0 : i32
    return %c0_i32, %c0_i32_0 : i32, i32
  }
  func.func @transform_4(%arg0: i32) -> (i32, i32, i32) {
    %c0_i32 = arith.constant 0 : i32
    %c0_i32_0 = arith.constant 0 : i32
    %c0_i32_1 = arith.constant 0 : i32
    %c0_i32_2 = arith.constant 0 : i32
    return %c0_i32, %c0_i32_0, %c0_i32_1 : i32, i32, i32
  }
  func.func @transform_5(%arg0: i32) -> (i32, i32, i32) {
    %c0_i32 = arith.constant 0 : i32
    %c0_i32_0 = arith.constant 0 : i32
    %c0_i32_1 = arith.constant 0 : i32
    return %arg0, %c0_i32, %c0_i32_0 : i32, i32, i32
  }
}

</mosaic_0001>

<bundles_post_ra>
// kernel: tpu_custom_call.1
= control target key start
LH: loop header
LB: loop body
LE: loop exit
PB: predicated region body
PF: predicated region fallthrough
CT: control target
= control target key end

     0   :  { %10 = vsyncpa [#allocation3], 0  ;;  %s2049_s0 = inlined_call_operand.vmem [shape: f32[2,8,32], index: 0, kind: input, shape index: {}]   ;;  %s2050_s1 = inlined_call_operand.vmem [shape: f32[32,32], index: 1, kind: input, shape index: {}]   ;;  %s2051_s2 = inlined_call_operand.vmem [shape: f32[32,16], index: 2, kind: input, shape index: {}]   ;;  %s2052_s3 = inlined_call_operand.vmem [shape: f32[32,16], index: 3, kind: input, shape index: {}]   ;;  %s2053_s4 = inlined_call_operand.vmem [shape: f32[4,8,32], index: 4, kind: input, shape index: {}]   ;;  %s2054_s5 = inlined_call_operand.hbm [shape: f32[2,8,32], index: 5, kind: output, shape index: {}]  }
   0x1   :  { %12 = vsyncpa [#allocation3 + $0x1], 0  ;;  %s1820_s18 = smov 0   ;;  %s1822_s19 = smov 0  }
   0x2   :  { %s1824_s20 = smov 0   ;;  %s1826_s21 = smov 0  }
   0x3 LB: > { %s1841_s22 = sadd.s32 4294967295, %s1781_s21   ;;  %s1479_s23 = sadd.s32 4294967294, %s1781_s21   ;;  %s1781_s21 = sphi %s1826_s21, %s2060_s21   ;;  %s1777_s20 = sphi %s1824_s20, %s2059_s20   ;;  %s1773_s19 = sphi %s1822_s19, %s2058_s19   ;;  %s1769_s18 = sphi %s1820_s18, %s2057_s18  }
   0x4   : > { %s1845_s24 = sadd.s32 1, %s1781_s21   ;;  %s135_s25 = sadd.s32 1, %s1777_s20 }
   0x5   : > { %s132_s26 = ssub.s32 %s1781_s21, %s1845_s24  ;;  %p145_p0 = scmp.ne.s32.totalorder %s1777_s20, %s1773_s19 }
   0x6   : > { %p133_p1 = scmp.eq.s32.totalorder %s132_s26, 0  ;;  %p146_p2 = scmp.eq.s32.totalorder %s1841_s22, 1 }
   0x7   : > { %p151_p3 = scmp.ne.s32.totalorder %s1773_s19, %s1769_s18  ;;  %p152_p4 = scmp.eq.s32.totalorder %s1479_s23, 1 }
   0x8   : > { %s1856_s27 = scalar_select %p133_p1, %s1777_s20, %s135_s25  }
   0x9   : > { %p1858_p5 = por %p146_p2, %p145_p0  ;;  %p1862_p6 = por %p152_p4, %p151_p3 }
   0xa   : > { %p1482_p7 = scmp.ge.s32.totalorder %s1781_s21, 1  ;;  %p189_p8 = scmp.lt.s32.totalorder %s1781_s21, 3 }
   0xc   : > { %p190_p9 = pnand %p1482_p7, %p189_p8 }
   0xd   : > { %v221_v0 = vld [vmem:[%s2050_s1] sm:$0xff] (!%p190_p9)  ;;  %v222_v1 = vld [vmem:[%s2050_s1 + $0x8] sm:$0xff] (!%p190_p9)  ;;  %v1783_v3 = vmov (!%p190_p9), 0.0|0.0   ;;  %v223_v6 = vld [vmem:[%s2050_s1 + $0x10] sm:$0xff] (!%p190_p9)  ;;  %p216_p10 = scmp.lt.s32.totalorder (!%p190_p9), %s1841_s22, 1  ;;  %vm1784_vm0 = vmmov (!%p190_p9), 0   ;;  %v755_v32 = vlaneseq (!%p190_p9) }
   0xe   : > { %193 = sbr.rel (%p190_p9) target bundleno = 1175 (0x497), region = 40  ;;  %v300_v2 = vld [vmem:[%s2051_s2] sm:$0xff] (!%p190_p9)  ;;  %1640 = vmatprep.subr.bf16.mxu0 (!%p190_p9), %v1783_v3  ;;  %1646 = vmatprep.subr.bf16.mxu1 (!%p190_p9), %v1783_v3  ;;  %v1641_v4 = vpack.c.bf16 (!%p190_p9), %v222_v1, %v221_v0  ;;  %v301_v5 = vld [vmem:[%s2051_s2 + $0x8] sm:$0xff] (!%p190_p9)  ;;  %v224_v7 = vld [vmem:[%s2050_s1 + $0x18] sm:$0xff] (!%p190_p9)  ;;  %v1785_v11 = vmov (!%p190_p9), 0.0   ;;  %vm225_vm1 = vcmask (!%p190_p9), 261120  }
   0xf   : > { %v1647_v8 = vpack.c.bf16 (!%p190_p9), %v301_v5, %v300_v2  ;;  %v302_v9 = vld [vmem:[%s2051_s2 + $0x10] sm:$0xff] (!%p190_p9)  ;;  %v303_v10 = vld [vmem:[%s2051_s2 + $0x18] sm:$0xff] (!%p190_p9)  ;;  %1555 = vmatprep.mubr.msk.f32.mxu0 (!%p190_p9), %vm1784_vm0, %v1785_v11  ;;  %1566 = vmatprep.mubr.msk.f32.mxu1 (!%p190_p9), %vm1784_vm0, %v1785_v11  ;;  %v1644_v12 = vpack.c.bf16 (!%p190_p9), %v224_v7, %v223_v6  ;;  %v374_v15 = vld [vmem:[%s2052_s3] sm:$0xff] (!%p190_p9)  ;;  %vm462_vm2 = vcmask (!%p190_p9), 64512   ;;  %s1786_s23 = smov (!%p190_p9), 120   ;;  %s1787_s25 = smov (!%p190_p9), 112  }
  0x10   : > { %1642 = vmatpush3.bf16.msra.mxu0 (!%p190_p9), %v1641_v4  ;;  %v1650_v13 = vpack.c.bf16 (!%p190_p9), %v303_v10, %v302_v9  ;;  %v375_v16 = vld [vmem:[%s2052_s3 + $0x8] sm:$0xff] (!%p190_p9)  ;;  %v376_v17 = vld [vmem:[%s2052_s3 + $0x10] sm:$0xff] (!%p190_p9)  ;;  %v377_v19 = vld [vmem:[%s2052_s3 + $0x18] sm:$0xff] (!%p190_p9)  ;;  %s1788_s26 = smov (!%p190_p9), 104   ;;  %v756_v33 = vshrl.u32 (!%p190_p9), %v755_v32, 7  ;;  %v758_v34 = vand.u32 (!%p190_p9), 127, %v755_v32 }
  0x11   : > { %1648 = vmatpush3.bf16.msra.mxu1 (!%p190_p9), %v1647_v8  ;;  %1643 = vmatprep.subr.bf16.mxu0 (!%p190_p9), %v1783_v3  ;;  %v1653_v18 = vpack.c.bf16 (!%p190_p9), %v375_v16, %v374_v15  ;;  %v1656_v20 = vpack.c.bf16 (!%p190_p9), %v377_v19, %v376_v17  ;;  %v1102_v2 = vld [vmem:[%s2053_s4] sm:$0xff] (!%p190_p9)  ;;  %v1103_v10 = vld [vmem:[%s2053_s4 + $0x8] sm:$0xff] (!%p190_p9)  ;;  %v1104_v16 = vld [vmem:[%s2053_s4 + $0x10] sm:$0xff] (!%p190_p9)  ;;  %s213_s13 = sand.u32 (!%p190_p9), 1, %s1773_s19   ;;  %s1505_s15 = sshll.u32 (!%p190_p9), %s1841_s22, 7 }
  0x12   : > { %1649 = vmatprep.subr.bf16.mxu1 (!%p190_p9), %v1783_v3  ;;  %vm759_vm3 = vcmp.le.s32.totalorder (!%p190_p9), %v758_v34, %v756_v33  ;;  %s1483_s14 = sshll.u32 (!%p190_p9), %s213_s13, 3 }
  0x13   : > { %s215_s16 = scalar_lea.vmem (!%p190_p9), [#allocation2], %s1483_s14 }
  0x14   : > { %1645 = vmatpush3.bf16.msra.mxu0 (!%p190_p9), %v1644_v12  ;;  %s1420_s17 = sshll.u32 (!%p190_p9), %s215_s16, 4  ;;  %s2008_s17 = int_to_ptr.vmem [resolvable:$true] %s1420_s17 }
  0x15   : > { %s217_s30 = scalar_select %p216_p10, %s1841_s22, 1  ;;  %1651 = vmatpush3.bf16.msra.mxu1 %v1650_v13  ;;  %1652 = vmatprep.subr.bf16.mxu0 %v1783_v3 }
  0x16   : > { %1580 = vmatprep.subr.mxu1 %v1785_v11  ;;  %s1407_s22 = scalar_lea.sflag [#allocation3], %s213_s13 }
  0x17   : > { %s1484_s6 = sshll.u32 %s217_s30, 3  ;;  %s1719_s30 = scalar_lea.vmem %s2008_s17, 128 }
  0x18   : > { %s219_s9 = scalar_lea.vmem %s2049_s0, %s1484_s6  ;;  %p1720_p11 = scmp.ne.s32.totalorder %s2008_s17, %s1719_s30 }
  0x19   : > { %v220_v14 = vld [vmem:[%s219_s9] sm:$0xff]  ;;  %s1789_s6 = smov [#allocation2]  }
  0x1a   : > { %1556 = vmatmul.mubr.msk.f32.vlgmr.msra.gmra.mrb[0].mxu0 %vm225_vm1, %v220_v14  ;;  %1567 = vmatmul.mubr.msk.f32.vlgmr.msra.gmra.mrb[0].mxu1 %vm225_vm1, %v220_v14  ;;  %p1721_p12 = pnand %p1720_p11, %p1858_p5  ;;  %s1723_s7 = sshll.u32 %s1789_s6, 4  ;;  %s1724_s7 = int_to_ptr.vmem [resolvable:$false] %s1723_s7 }
  0x1b   : > { %1577 = vmatprep.mubr.msk.f32.mxu0 %vm1784_vm0, %v1785_v11  ;;  %1582 = vmatprep.mubr.msk.f32.mxu1 %vm1784_vm0, %v1785_v11  ;;  %s1725_s8 = scalar_lea.vmem %s1724_s7, 256  ;;  %p1726_p0 = scmp.lt.s32.totalorder %s2008_s17, %s1724_s7 }
  0x1c   : > { %1654 = vmatpush3.bf16.msra.mxu0 %v1653_v18  ;;  %p1722_p13 = pneg %p1721_p12  ;;  %p1727_p1 = scmp.lt.s32.totalorder %s1725_s8, %s1719_s30 }
  0x1d   : > { %1655 = vmatprep.subr.bf16.mxu0 %v1783_v3 }
  0x1e   : > { %p1728_p2 = por %p1727_p1, %p1726_p0 }
  0x20   : > { %1657 = vmatpush3.bf16.msra.mxu0 %v1656_v20  ;;  %p1729_p3 = pnand %p1728_p2, %p1722_p13 }
  0x21   : > { %1590 = vmatprep.subr.mxu0 %v1785_v11 }
  0x23   : > { %1578 = vmatmul.mubr.msk.f32.vlgmr.msra.gmra.mrb[2].mxu0 %vm225_vm1, %v220_v14 }
  0x24   : > { %1592 = vmatprep.mubr.msk.f32.mxu0 %vm1784_vm0, %v1785_v11 }
  0xed   : > { %v295_v21 = vpop.f32.mrb[0].mxu0  ;;  %v370_v23 = vpop.f32.mrb[0].mxu1 }
  0xee   : > { %v299_v22 = vmul.f32 0.35355338, %v295_v21  ;;  %v1557_v24 = vpop.f32.mrb[1].mxu0  ;;  %456 = vrot.lane.b32.xlu0 %v370_v23, %s1786_s23  ;;  %v1568_v25 = vpop.f32.mrb[1].mxu1  ;;  %1581 = vmatpush3.xpose.msk.msra.mxu1 %vm462_vm2, %v370_v23 }
  0xef   : > { %1585 = vmatprep.subr.mxu1 %v1785_v11 }
  0xf0   : > { %451 = vrot.lane.b32.xlu1 %v299_v22, %s1787_s25 }
  0xf1   : > { %1583 = vmatmul.mubr.msk.f32.vlgmr.msra.gmra.mrb[2].mxu1 %vm462_vm2, %v299_v22 }
  0xf2   : > { %449 = vrot.lane.b32.xlu0 %v299_v22, %s1786_s23  ;;  %1586 = vmatpush3.xpose.msk.msra.mxu1 %vm462_vm2, %v370_v23 }
  0xf3   : > { %1587 = vmatprep.mubr.msk.f32.mxu1 %vm1784_vm0, %v1785_v11  ;;  %1595 = vmatprep.subr.mxu1 %v1785_v11 }
  0xf4   : > { %453 = vrot.lane.b32.xlu1 %v299_v22, %s1788_s26  ;;  %s2006_s26 = scalar_lea.hbm %s2054_s5, %s1505_s15 }
  0xf6   : > { %v444_v26 = vpop.f32.mrb[2].mxu0 }
  0xf7   : > { %v1579_v27 = vpop.f32.mrb[3].mxu0 }
 0x160   : > { %v457_v28 = vpop.permute.xlu0 %456 }
 0x161   : > { %1591 = vmatpush3.xpose.msk.msra.mxu0 %vm462_vm2, %v457_v28 }
 0x162   : > { %v452_v29 = vpop.permute.xlu1 %451  ;;  %1600 = vmatprep.subr.mxu0 %v1785_v11 }
 0x164   : > { %1593 = vmatmul.mubr.msk.f32.vlgmr.msra.gmra.mrb[4].mxu0 %vm462_vm2, %v452_v29  ;;  %v450_v30 = vpop.permute.xlu0 %449 }
 0x165   : > { %1588 = vmatmul.mubr.msk.f32.vlgmr.msra.gmra.mrb[4].mxu1 %vm462_vm2, %v450_v30  ;;  %1601 = vmatpush3.msra.mxu0 %v444_v26 }
 0x166   : > { %1596 = vmatpush3.xpose.msk.msra.mxu1 %vm462_vm2, %v457_v28  ;;  %1597 = vmatprep.mubr.msk.f32.mxu1 %vm1784_vm0, %v1785_v11  ;;  %v454_v31 = vpop.permute.xlu1 %453  ;;  %v1105_v28 = vld [vmem:[%s2053_s4 + $0x18] sm:$0xff] }
 0x167   : > { %1605 = vmatprep.subr.mxu1 %v1785_v11  ;;  %1602 = vmatprep.mubr.msk.f32.mxu0 %vm1784_vm0, %v1785_v11 }
 0x168   : > { %1610 = vmatprep.subr.mxu0 %v1785_v11 }
 0x169   : > { %1598 = vmatmul.mubr.msk.f32.vlgmr.msra.gmra.mrb[6].mxu1 %vm462_vm2, %v454_v31 }
 0x16a   : > { %1606 = vmatpush3.msra.mxu1 %v444_v26  ;;  %1607 = vmatprep.mubr.msk.f32.mxu1 %vm1784_vm0, %v1785_v11 }
 0x16b   : > { %1615 = vmatprep.subr.mxu1 %v1785_v11 }
 0x1c4   : > { %v533_v35 = vpop.f32.mrb[2].mxu1 }
 0x1c5   : > { %v762_v36 = vsel %vm759_vm3, %v533_v35, -1e+30  ;;  %v1584_v37 = vpop.f32.mrb[3].mxu1 }
 0x1c6   : > { %v766_v38 = vsel %vm462_vm2, %v762_v36, -inf }
 0x1c7   : > { %767 = vmax.xlane.f32.xlu0 %v766_v38 }
 0x237   : > { %v679_v39 = vpop.f32.mrb[4].mxu0 }
 0x238   : > { %v764_v40 = vsel %vm759_vm3, %v679_v39, -1e+30  ;;  %v605_v41 = vpop.f32.mrb[4].mxu1  ;;  %v1594_v42 = vpop.f32.mrb[5].mxu0 }
 0x239   : > { %v763_v43 = vsel %vm759_vm3, %v605_v41, -1e+30  ;;  %v1589_v44 = vpop.f32.mrb[5].mxu1  ;;  %v772_v45 = vsel %vm462_vm2, %v764_v40, -inf }
 0x23a   : > { %773 = vmax.xlane.f32.xlu0 %v772_v45  ;;  %v769_v46 = vsel %vm462_vm2, %v763_v43, -inf }
 0x23b   : > { %770 = vmax.xlane.f32.xlu1 %v769_v46 }
 0x23c   : > { %v751_v47 = vpop.f32.mrb[6].mxu1 }
 0x23d   : > { %v765_v48 = vsel %vm759_vm3, %v751_v47, -1e+30  ;;  %v1599_v49 = vpop.f32.mrb[7].mxu1 }
 0x23e   : > { %v775_v50 = vsel %vm462_vm2, %v765_v48, -inf }
 0x23f   : > { %776 = vmax.xlane.f32.xlu0 %v775_v50 }
 0x24c   : > { %459 = vrot.lane.b32.xlu1 %v444_v26, %s1786_s23 }
 0x254   : > { %v768_v51 = vpop.xlane.xlu0 %767 }
 0x255   : > { %v778_v52 = vsub.f32 %v762_v36, %v768_v51 }
 0x257   : > { %v782_v53 = vmul.f32 1.442695, %v778_v52 }
 0x259   : > { %1703 = vpow2.f32 %v782_v53 }
 0x263   : > { %v1704_v54 = vpop.eup %1703 }
 0x264   : > { %1603 = vmatmul.mubr.msk.f32.vlgmr.msra.gmra.mrb[6].mxu0 %vm462_vm2, %v1704_v54  ;;  %v790_v55 = vsel %vm462_vm2, %v1704_v54, 0.0 }
 0x265   : > { %791 = vadd.xlane.f32.xlu0 %v790_v55  ;;  %1612 = vmatprep.mubr.msk.f32.mxu0 %vm1784_vm0, %v1785_v11 }
 0x2c7   : > { %v774_v56 = vpop.xlane.xlu0 %773 }
 0x2c8   : > { %v780_v57 = vsub.f32 %v764_v40, %v774_v56  ;;  %v771_v58 = vpop.xlane.xlu1 %770 }
 0x2c9   : > { %v779_v59 = vsub.f32 %v763_v43, %v771_v58 }
 0x2ca   : > { %v786_v60 = vmul.f32 1.442695, %v780_v57 }
 0x2cb   : > { %v784_v61 = vmul.f32 1.442695, %v779_v59 }
 0x2cc   : > { %1705 = vpow2.f32 %v786_v60  ;;  %v460_v62 = vpop.permute.xlu1 %459  ;;  %v777_v63 = vpop.xlane.xlu0 %776 }
 0x2cd   : > { %1707 = vpow2.f32 %v784_v61  ;;  %v781_v0 = vsub.f32 %v765_v48, %v777_v63  ;;  %1611 = vmatpush3.msra.mxu0 %v460_v62 }
 0x2ce   : > { %1620 = vmatprep.subr.mxu0 %v1785_v11 }
 0x2cf   : > { %v788_v1 = vmul.f32 1.442695, %v781_v0 }
 0x2d1   : > { %1709 = vpow2.f32 %v788_v1 }
 0x2d6   : > { %v1706_v3 = vpop.eup %1705 }
 0x2d7   : > { %v1708_v4 = vpop.eup %1707  ;;  %1613 = vmatmul.mubr.msk.f32.vlgmr.msra.gmra.mrb[8].mxu0 %vm462_vm2, %v1706_v3  ;;  %v796_v7 = vsel %vm462_vm2, %v1706_v3, 0.0 }
 0x2d8   : > { %1608 = vmatmul.mubr.msk.f32.vlgmr.msra.gmra.mrb[8].mxu1 %vm462_vm2, %v1708_v4  ;;  %v793_v5 = vsel %vm462_vm2, %v1708_v4, 0.0  ;;  %1621 = vmatpush3.msra.mxu0 %v1102_v2 }
 0x2d9   : > { %1616 = vmatpush3.msra.mxu1 %v460_v62  ;;  %794 = vadd.xlane.f32.xlu0 %v793_v5 }
 0x2da   : > { %1617 = vmatprep.mubr.msk.f32.mxu1 %vm1784_vm0, %v1785_v11  ;;  %1622 = vmatprep.mubr.msk.f32.mxu0 %vm1784_vm0, %v1785_v11 }
 0x2db   : > { %v1710_v6 = vpop.eup %1709  ;;  %1625 = vmatprep.subr.mxu1 %v1785_v11  ;;  %1630 = vmatprep.subr.mxu0 %v1785_v11 }
 0x2dc   : > { %1618 = vmatmul.mubr.msk.f32.vlgmr.msra.gmra.mrb[10].mxu1 %vm462_vm2, %v1710_v6  ;;  %v799_v8 = vsel %vm462_vm2, %v1710_v6, 0.0 }
 0x2dd   : > { %797 = vadd.xlane.f32.xlu0 %v796_v7  ;;  %1627 = vmatprep.mubr.msk.f32.mxu1 %vm1784_vm0, %v1785_v11 }
 0x2de   : > { %1626 = vmatpush3.msra.mxu1 %v1103_v10 }
 0x2df   : > { %1635 = vmatprep.subr.mxu1 %v1785_v11 }
 0x2e1   : > { %800 = vadd.xlane.f32.xlu0 %v799_v8 }
 0x2f2   : > { %v792_v9 = vpop.xlane.xlu0 %791 }
 0x2f3   : > { %1711 = vrcp.f32 %v792_v9 }
 0x2fd   : > { %v1712_v12 = vpop.eup %1711 }
 0x337   : > { %v871_v13 = vpop.f32.mrb[6].mxu0 }
 0x338   : > { %v1098_v14 = vmul.f32 %v1712_v12, %v871_v13  ;;  %v1604_v15 = vpop.f32.mrb[7].mxu0 }
 0x33a   : > { %1623 = vmatmul.mubr.msk.f32.vlgmr.msra.gmra.mrb[10].mxu0 %vm462_vm2, %v1098_v14 }
 0x33b   : > { %1631 = vmatpush3.msra.mxu0 %v1104_v16  ;;  %1632 = vmatprep.mubr.msk.f32.mxu0 %vm1784_vm0, %v1785_v11 }
 0x366   : > { %v795_v17 = vpop.xlane.xlu0 %794 }
 0x36a   : > { %v798_v18 = vpop.xlane.xlu0 %797 }
 0x36b   : > { %1713 = vrcp.f32 %v798_v18 }
 0x36c   : > { %1715 = vrcp.f32 %v795_v17 }
 0x36e   : > { %v801_v19 = vpop.xlane.xlu0 %800 }
 0x36f   : > { %1717 = vrcp.f32 %v801_v19 }
 0x375   : > { %v1714_v20 = vpop.eup %1713 }
 0x376   : > { %v1716_v22 = vpop.eup %1715 }
 0x379   : > { %v1718_v29 = vpop.eup %1717 }
 0x3aa   : > { %v1017_v21 = vpop.f32.mrb[8].mxu0 }
 0x3ab   : > { %v1100_v23 = vmul.f32 %v1714_v20, %v1017_v21  ;;  %v944_v24 = vpop.f32.mrb[8].mxu1  ;;  %v1614_v25 = vpop.f32.mrb[9].mxu0 }
 0x3ac   : > { %v1099_v26 = vmul.f32 %v1716_v22, %v944_v24  ;;  %v1609_v27 = vpop.f32.mrb[9].mxu1 }
 0x3ad   : > { %1633 = vmatmul.mubr.msk.f32.vlgmr.msra.gmra.mrb[12].mxu0 %vm462_vm2, %v1100_v23 }
 0x3ae   : > { %1628 = vmatmul.mubr.msk.f32.vlgmr.msra.gmra.mrb[12].mxu1 %vm462_vm2, %v1099_v26 }
 0x3af   : > { %1636 = vmatpush3.msra.mxu1 %v1105_v28  ;;  %v1090_v30 = vpop.f32.mrb[10].mxu1  ;;  %1637 = vmatprep.mubr.msk.f32.mxu1 %vm1784_vm0, %v1785_v11 }
 0x3b0   : > { %v1101_v31 = vmul.f32 %v1718_v29, %v1090_v30  ;;  %v1619_v32 = vpop.f32.mrb[11].mxu1 }
 0x3b2   : > { %1638 = vmatmul.mubr.msk.f32.vlgmr.msra.gmra.mrb[14].mxu1 %vm462_vm2, %v1101_v31 }
 0x40d   : > { %v1175_v33 = vpop.f32.mrb[10].mxu0 }
 0x40e   : > { %v1624_v34 = vpop.f32.mrb[11].mxu0  ;;  %v1398_v38 = vsel %vm225_vm1, %v1175_v33, 0.0 }
 0x480   : > { %v1321_v35 = vpop.f32.mrb[12].mxu0 }
 0x481   : > { %v1248_v36 = vpop.f32.mrb[12].mxu1  ;;  %v1634_v37 = vpop.f32.mrb[13].mxu0  ;;  %v1401_v11 = vsel %vm225_vm1, %v1321_v35, 0.0 }
 0x482   : > { %v1399_v39 = vsel %vm225_vm1, %v1248_v36, 0.0  ;;  %v1629_v40 = vpop.f32.mrb[13].mxu1 }
 0x483   : > { %v1400_v41 = vadd.f32 %v1399_v39, %v1398_v38 }
 0x485   : > { %v1394_v42 = vpop.f32.mrb[14].mxu1  ;;  %v1402_v43 = vadd.f32 %v1401_v11, %v1400_v41 }
 0x486   : > { %v1403_v44 = vsel %vm225_vm1, %v1394_v42, 0.0  ;;  %v1639_v45 = vpop.f32.mrb[15].mxu1 }
 0x487   : > { %v1404_v46 = vadd.f32 %v1403_v44, %v1402_v43 }
 0x489   : > { %1405 = vst.msk [vmem:[%s215_s16] sm:$0xff] %vm225_vm1, %v1404_v46 }
 0x48a   : > { %1732 = shalt.err (!%p1729_p3)
}
 0x48b   : > { %s1733_s9 = scalar_lea.hbm %s2006_s26, 128  ;;  %s1737_s12 = scalar_lea.hbm %s2054_s5, 256 }
 0x48c   : > { %p1734_p4 = scmp.ne.s32.totalorder %s2006_s26, %s1733_s9  ;;  %p1738_p9 = scmp.lt.u32.totalorder %s2006_s26, %s2054_s5 }
 0x48d   : > { %p1739_p10 = scmp.lt.u32.totalorder %s1737_s12, %s1733_s9  ;;  %p1741_p12 = scmp.lt.u32.totalorder %s1733_s9, %s2006_s26 }
 0x48e   : > { %p1735_p7 = pnand %p1734_p4, %p1858_p5 }
 0x48f   : > { %p1740_p11 = por %p1739_p10, %p1738_p9 }
 0x490   : > { %p1736_p8 = pneg %p1735_p7 }
 0x491   : > { %p1742_p13 = por %p1741_p12, %p1740_p11 }
 0x493   : > { %p1743_p0 = pnand %p1742_p13, %p1736_p8 }
 0x495   : > { %1746 = shalt.err (!%p1743_p0)
}
 0x496   : > { %1658 = dma.vmem_to_hbm [thread:$0]  (%p1858_p5), %s2008_s17, 128, %s2006_s26, %s1407_s22  }
 0x497 PF: > { %p1664_p1 = scmp.ge.s32.totalorder %s1781_s21, 2  ;;  %s1432_s15 = sand.u32 1, %s1769_s18  }
 0x498   : > { %s1433_s16 = scalar_lea.sflag [#allocation3], %s1432_s15 }
 0x499   : > { %p1661_p2 = pnand %p1664_p1, %p1862_p6 }
 0x49b   : > { %1764 = dma.done.wait (!%p1661_p2), %s1433_s16, 128  }
 0x49c   : > { %1766 = vsyncadd (!%p1661_p2), %s1433_s16, 4294967168  ;;  %p15_p3 = scmp.ge.s32.totalorder %s1845_s24, 4   ;;  %s2057_s18 = smov %s1773_s19 }
 0x49d   : > { %s2058_s19 = smov %s1777_s20  ;;  %s2059_s20 = smov %s1856_s27 }
 0x49e   : > { %s2060_s21 = smov %s1845_s24  ;;  %17 = sbr.rel (!%p15_p3) target bundleno = 3 (0x3), region = 75 }
 0x4a5   :  { %1438 = vsyncpa [#allocation3], 1 }
 0x4a6   :  { %1440 = vsyncpa [#allocation3 + $0x1], 1 }

</bundles_post_ra>
